<compile_context>
chip_gen: v6e
topology: v6e:2x2x1
jax: 0.10.0
libtpu: 0.0.40
codegen_flags: <defaults>
</compile_context>

<pallas_src>
import functools

import jax
import jax.numpy as jnp
from jax import lax
from jax.experimental import pallas as pl
from jax.experimental.pallas import tpu as pltpu


def _sepconv_kernel(x_ref, wdw_ref, wpw_ref, out_ref, *, W, HW, KH, KW, pad):
    """One packed group of NB batch elements per grid step.

    x_ref   : (1, NB*C, HW)      input; (batch,channel) on sublanes, flat spatial on lanes
    wdw_ref : (KH*KW, NB*C, HW)  depthwise weights, pre-broadcast along lanes with the
                                 per-tap zero-padding mask already folded in
    wpw_ref : (NB*O, NB*C)       pointwise 1x1 weights, block-diagonal over the packed batch
    out_ref : (1, NB*O, HW)      output; channel-major, lane-dense
    """
    x = x_ref[0].astype(jnp.float32)                       # (NB*C, HW)

    # ---- depthwise conv: 9 taps. Spatial shift = lane roll (XLU); the zero
    # padding and the per-(n,c) tap weight are pre-folded into wdw_ref, so each
    # tap is a single FMA on a fully occupied tile.
    acc = x * wdw_ref[pad * KW + pad].astype(jnp.float32)  # center tap, no roll
    for kh in range(KH):
        dh = kh - pad
        for kw in range(KW):
            dw = kw - pad
            if dh == 0 and dw == 0:
                continue
            shift = dh * W + dw                            # tap[p] = x[p + shift]
            amt = (-shift) % HW                            # non-negative roll amount
            tap = pltpu.roll(x, shift=amt, axis=1)         # axis must be non-negative
            acc = acc + tap * wdw_ref[kh * KW + kw].astype(jnp.float32)

    # ---- pointwise 1x1 conv: one block-diagonal MXU matmul for the whole
    # packed batch -> (NB*O, HW), channel-major and lane-dense.
    out = jnp.dot(wpw_ref[...].astype(jnp.float32), acc,
                  preferred_element_type=jnp.float32)
    out_ref[0] = out.astype(out_ref.dtype)


def separable_conv2d(x_nchw, w_dw, w_pw, *, stride=1, padding=1, dilation=1):
    """x_nchw: (N, C, H, W); w_dw: (C, 1, KH, KW); w_pw: (O, C, 1, 1)."""
    assert stride == 1 and dilation == 1, "kernel covers stride=1, dilation=1"
    N, C, H, W = x_nchw.shape
    KH, KW = w_dw.shape[2], w_dw.shape[3]
    O = w_pw.shape[0]
    # "Same"-size output (holds for kernel_size=3, padding=1).
    assert 2 * padding == KH - 1 and 2 * padding == KW - 1
    HW = H * W

    # Pack NB batch elements per grid step so the sublane dim fills a vreg
    # (8 f32 rows).  For N=2, C=4 this gives NB=2 -> a single grid step.
    NB = max(1, 8 // C)
    while N % NB:
        NB -= 1
    G = N // NB

    # Only free reshapes on the data path -- no pad, no transpose.
    x_flat = x_nchw.reshape(G, NB * C, HW)

    # --- depthwise weights: tile per packed batch element, fold in the
    # zero-padding mask per tap, pre-broadcast along lanes -> (KH*KW, NB*C, HW).
    wdw_flat = w_dw[:, 0].reshape(C, KH * KW).astype(jnp.float32)        # (C, 9)
    wdw_tiled = jnp.tile(wdw_flat, (NB, 1))                              # (NB*C, 9)
    pos = jnp.arange(HW, dtype=jnp.int32)
    row, col = pos // W, pos % W
    taps = []
    for kh in range(KH):
        dh = kh - padding
        for kw in range(KW):
            dw = kw - padding
            valid = ((row + dh >= 0) & (row + dh < H) &
                     (col + dw >= 0) & (col + dw < W)).astype(jnp.float32)  # (HW,)
            taps.append(wdw_tiled[:, kh * KW + kw, None] * valid[None, :])  # (NB*C, HW)
    wdw_bcast = jnp.stack(taps, axis=0)                                  # (9, NB*C, HW)

    # --- pointwise weights: block-diagonal over the packed batch -> (NB*O, NB*C).
    wpw_flat = w_pw[:, :, 0, 0].astype(jnp.float32)                      # (O, C)
    wpw_bd = jnp.kron(jnp.eye(NB, dtype=jnp.float32), wpw_flat)          # (NB*O, NB*C)

    kernel = functools.partial(_sepconv_kernel, W=W, HW=HW, KH=KH, KW=KW,
                               pad=padding)

    cost = pl.CostEstimate(
        flops=2 * N * HW * (C * KH * KW + O * C),
        transcendentals=0,
        bytes_accessed=4 * (N * C * HW + N * O * HW
                            + KH * KW * NB * C * HW + NB * O * NB * C),
    )

    out_flat = pl.pallas_call(
        kernel,
        out_shape=jax.ShapeDtypeStruct((G, NB * O, HW), x_nchw.dtype),
        grid_spec=pltpu.PrefetchScalarGridSpec(
            num_scalar_prefetch=0,
            grid=(G,),
            in_specs=[
                pl.BlockSpec((1, NB * C, HW), lambda g: (g, 0, 0)),
                pl.BlockSpec((KH * KW, NB * C, HW), lambda g: (0, 0, 0)),
                pl.BlockSpec((NB * O, NB * C), lambda g: (0, 0)),
            ],
            out_specs=pl.BlockSpec((1, NB * O, HW), lambda g: (g, 0, 0)),
        ),
        compiler_params=pltpu.CompilerParams(
            dimension_semantics=(("parallel",) if G > 1 else ("arbitrary",))),
        cost_estimate=cost,
    )(x_flat, wdw_bcast, wpw_bd)

    return out_flat.reshape(N, O, H, W)                       # free reshape (NCHW)


def _reference(x_nchw, w_dw, w_pw, *, padding=1):
    """Pure-JAX reference matching PyTorch conv semantics."""
    C = x_nchw.shape[1]
    y = lax.conv_general_dilated(
        x_nchw, w_dw, window_strides=(1, 1),
        padding=[(padding, padding), (padding, padding)],
        dimension_numbers=("NCHW", "OIHW", "NCHW"),
        feature_group_count=C)
    z = lax.conv_general_dilated(
        y, w_pw, window_strides=(1, 1), padding=[(0, 0), (0, 0)],
        dimension_numbers=("NCHW", "OIHW", "NCHW"))
    return z


if __name__ == "__main__":
    # Module hyperparameters.
    in_channels, out_channels = 4, 8
    kernel_size, stride, padding, dilation = 3, 1, 1, 1

    N, H, W = 2, 16, 16

    key = jax.random.PRNGKey(0)
    kx, kdw, kpw = jax.random.split(key, 3)

    x = jax.random.normal(kx, (N, in_channels, H, W), dtype=jnp.float32)
    # Depthwise conv weight: (in_channels, 1, KH, KW)  (groups == in_channels)
    w_dw = jax.random.normal(
        kdw, (in_channels, 1, kernel_size, kernel_size), dtype=jnp.float32) * 0.1
    # Pointwise conv weight: (out_channels, in_channels, 1, 1)
    w_pw = jax.random.normal(
        kpw, (out_channels, in_channels, 1, 1), dtype=jnp.float32) * 0.1

    out = separable_conv2d(x, w_dw, w_pw,
                           stride=stride, padding=padding, dilation=dilation)
    out = jax.block_until_ready(out)

    ref = jax.block_until_ready(_reference(x, w_dw, w_pw, padding=padding))
    assert out.shape == ref.shape == (N, out_channels, H, W)
    assert jnp.allclose(out, ref, atol=1e-4, rtol=1e-4)

    print("KERNEL_OK")
</pallas_src>

<mosaic_0001>
module attributes {stable_mosaic.version = 11 : i64} {
  func.func @_sepconv_kernel(%arg0: i32, %arg1: memref<1x8x256xf32, #tpu.memory_space<vmem>>, %arg2: memref<9x8x256xf32, #tpu.memory_space<vmem>>, %arg3: memref<16x8xf32, #tpu.memory_space<vmem>>, %arg4: memref<1x16x256xf32, #tpu.memory_space<vmem>>) attributes {dimension_semantics = [#tpu.dimension_semantics<arbitrary>], iteration_bounds = array<i64: 1>, scalar_prefetch = 0 : i64, scratch_operands = 0 : i64, tpu.core_type = #tpu.core_type<tc>, window_params = [{transform_indices = @transform_0, window_bounds = array<i64: 1, 8, 256>}, {pipeline_mode = #tpu.pipeline_mode<synchronous>, transform_indices = @transform_1, window_bounds = array<i64: 9, 8, 256>}, {pipeline_mode = #tpu.pipeline_mode<synchronous>, transform_indices = @transform_2, window_bounds = array<i64: 16, 8>}, {transform_indices = @transform_3, window_bounds = array<i64: 1, 16, 256>}]} {
    %c0 = arith.constant 0 : index
    %c0_0 = arith.constant 0 : index
    %c0_1 = arith.constant 0 : index
    %0 = vector.load %arg1[%c0, %c0_0, %c0_1] : memref<1x8x256xf32, #tpu.memory_space<vmem>>, vector<1x8x256xf32>
    %1 = vector.shape_cast %0 : vector<1x8x256xf32> to vector<8x256xf32>
    %c4 = arith.constant 4 : index
    %c0_2 = arith.constant 0 : index
    %c0_3 = arith.constant 0 : index
    %2 = vector.load %arg2[%c4, %c0_2, %c0_3] : memref<9x8x256xf32, #tpu.memory_space<vmem>>, vector<1x8x256xf32>
    %3 = vector.shape_cast %2 : vector<1x8x256xf32> to vector<8x256xf32>
    %4 = arith.mulf %1, %3 : vector<8x256xf32>
    %c17_i32 = arith.constant 17 : i32
    %5 = tpu.dynamic_rotate %1 by %c17_i32 dim 1 : vector<8x256xf32>, i32 -> vector<8x256xf32>
    %c0_4 = arith.constant 0 : index
    %c0_5 = arith.constant 0 : index
    %c0_6 = arith.constant 0 : index
    %6 = vector.load %arg2[%c0_4, %c0_5, %c0_6] : memref<9x8x256xf32, #tpu.memory_space<vmem>>, vector<1x8x256xf32>
    %7 = vector.shape_cast %6 : vector<1x8x256xf32> to vector<8x256xf32>
    %8 = arith.mulf %5, %7 : vector<8x256xf32>
    %9 = arith.addf %4, %8 : vector<8x256xf32>
    %c16_i32 = arith.constant 16 : i32
    %10 = tpu.dynamic_rotate %1 by %c16_i32 dim 1 : vector<8x256xf32>, i32 -> vector<8x256xf32>
    %c1 = arith.constant 1 : index
    %c0_7 = arith.constant 0 : index
    %c0_8 = arith.constant 0 : index
    %11 = vector.load %arg2[%c1, %c0_7, %c0_8] : memref<9x8x256xf32, #tpu.memory_space<vmem>>, vector<1x8x256xf32>
    %12 = vector.shape_cast %11 : vector<1x8x256xf32> to vector<8x256xf32>
    %13 = arith.mulf %10, %12 : vector<8x256xf32>
    %14 = arith.addf %9, %13 : vector<8x256xf32>
    %c15_i32 = arith.constant 15 : i32
    %15 = tpu.dynamic_rotate %1 by %c15_i32 dim 1 : vector<8x256xf32>, i32 -> vector<8x256xf32>
    %c2 = arith.constant 2 : index
    %c0_9 = arith.constant 0 : index
    %c0_10 = arith.constant 0 : index
    %16 = vector.load %arg2[%c2, %c0_9, %c0_10] : memref<9x8x256xf32, #tpu.memory_space<vmem>>, vector<1x8x256xf32>
    %17 = vector.shape_cast %16 : vector<1x8x256xf32> to vector<8x256xf32>
    %18 = arith.mulf %15, %17 : vector<8x256xf32>
    %19 = arith.addf %14, %18 : vector<8x256xf32>
    %c1_i32 = arith.constant 1 : i32
    %20 = tpu.dynamic_rotate %1 by %c1_i32 dim 1 : vector<8x256xf32>, i32 -> vector<8x256xf32>
    %c3 = arith.constant 3 : index
    %c0_11 = arith.constant 0 : index
    %c0_12 = arith.constant 0 : index
    %21 = vector.load %arg2[%c3, %c0_11, %c0_12] : memref<9x8x256xf32, #tpu.memory_space<vmem>>, vector<1x8x256xf32>
    %22 = vector.shape_cast %21 : vector<1x8x256xf32> to vector<8x256xf32>
    %23 = arith.mulf %20, %22 : vector<8x256xf32>
    %24 = arith.addf %19, %23 : vector<8x256xf32>
    %c255_i32 = arith.constant 255 : i32
    %25 = tpu.dynamic_rotate %1 by %c255_i32 dim 1 : vector<8x256xf32>, i32 -> vector<8x256xf32>
    %c5 = arith.constant 5 : index
    %c0_13 = arith.constant 0 : index
    %c0_14 = arith.constant 0 : index
    %26 = vector.load %arg2[%c5, %c0_13, %c0_14] : memref<9x8x256xf32, #tpu.memory_space<vmem>>, vector<1x8x256xf32>
    %27 = vector.shape_cast %26 : vector<1x8x256xf32> to vector<8x256xf32>
    %28 = arith.mulf %25, %27 : vector<8x256xf32>
    %29 = arith.addf %24, %28 : vector<8x256xf32>
    %c241_i32 = arith.constant 241 : i32
    %30 = tpu.dynamic_rotate %1 by %c241_i32 dim 1 : vector<8x256xf32>, i32 -> vector<8x256xf32>
    %c6 = arith.constant 6 : index
    %c0_15 = arith.constant 0 : index
    %c0_16 = arith.constant 0 : index
    %31 = vector.load %arg2[%c6, %c0_15, %c0_16] : memref<9x8x256xf32, #tpu.memory_space<vmem>>, vector<1x8x256xf32>
    %32 = vector.shape_cast %31 : vector<1x8x256xf32> to vector<8x256xf32>
    %33 = arith.mulf %30, %32 : vector<8x256xf32>
    %34 = arith.addf %29, %33 : vector<8x256xf32>
    %c240_i32 = arith.constant 240 : i32
    %35 = tpu.dynamic_rotate %1 by %c240_i32 dim 1 : vector<8x256xf32>, i32 -> vector<8x256xf32>
    %c7 = arith.constant 7 : index
    %c0_17 = arith.constant 0 : index
    %c0_18 = arith.constant 0 : index
    %36 = vector.load %arg2[%c7, %c0_17, %c0_18] : memref<9x8x256xf32, #tpu.memory_space<vmem>>, vector<1x8x256xf32>
    %37 = vector.shape_cast %36 : vector<1x8x256xf32> to vector<8x256xf32>
    %38 = arith.mulf %35, %37 : vector<8x256xf32>
    %39 = arith.addf %34, %38 : vector<8x256xf32>
    %c239_i32 = arith.constant 239 : i32
    %40 = tpu.dynamic_rotate %1 by %c239_i32 dim 1 : vector<8x256xf32>, i32 -> vector<8x256xf32>
    %c8 = arith.constant 8 : index
    %c0_19 = arith.constant 0 : index
    %c0_20 = arith.constant 0 : index
    %41 = vector.load %arg2[%c8, %c0_19, %c0_20] : memref<9x8x256xf32, #tpu.memory_space<vmem>>, vector<1x8x256xf32>
    %42 = vector.shape_cast %41 : vector<1x8x256xf32> to vector<8x256xf32>
    %43 = arith.mulf %40, %42 : vector<8x256xf32>
    %44 = arith.addf %39, %43 : vector<8x256xf32>
    %c0_21 = arith.constant 0 : index
    %c0_22 = arith.constant 0 : index
    %45 = vector.load %arg3[%c0_21, %c0_22] : memref<16x8xf32, #tpu.memory_space<vmem>>, vector<16x8xf32>
    %cst = arith.constant dense<0.000000e+00> : vector<16x256xf32>
    %46 = tpu.matmul %45, %44, %cst {dimension_numbers = #tpu.dot_dimension_numbers<[1], [0], [0], [1], [0, 0, 1, 1], [], []>} : vector<16x8xf32>, vector<8x256xf32>, vector<16x256xf32> -> vector<16x256xf32>
    %c0_23 = arith.constant 0 : index
    %c0_24 = arith.constant 0 : index
    %c0_25 = arith.constant 0 : index
    %47 = vector.load %arg4[%c0_23, %c0_24, %c0_25] : memref<1x16x256xf32, #tpu.memory_space<vmem>>, vector<1x16x256xf32>
    %48 = vector.shape_cast %47 : vector<1x16x256xf32> to vector<16x256xf32>
    %49 = vector.shape_cast %46 : vector<16x256xf32> to vector<1x16x256xf32>
    tpu.vector_store %arg4[%c0_23, %c0_24, %c0_25], %49 {strides = array<i32>} : memref<1x16x256xf32, #tpu.memory_space<vmem>>, vector<1x16x256xf32>,
    return
  }
  func.func @transform_0(%arg0: i32) -> (i32, i32, i32) {
    %c0_i32 = arith.constant 0 : i32
    %c0_i32_0 = arith.constant 0 : i32
    %c0_i32_1 = arith.constant 0 : i32
    return %arg0, %c0_i32, %c0_i32_0 : i32, i32, i32
  }
  func.func @transform_1(%arg0: i32) -> (i32, i32, i32) {
    %c0_i32 = arith.constant 0 : i32
    %c0_i32_0 = arith.constant 0 : i32
    %c0_i32_1 = arith.constant 0 : i32
    %c0_i32_2 = arith.constant 0 : i32
    return %c0_i32, %c0_i32_0, %c0_i32_1 : i32, i32, i32
  }
  func.func @transform_2(%arg0: i32) -> (i32, i32) {
    %c0_i32 = arith.constant 0 : i32
    %c0_i32_0 = arith.constant 0 : i32
    %c0_i32_1 = arith.constant 0 : i32
    return %c0_i32, %c0_i32_0 : i32, i32
  }
  func.func @transform_3(%arg0: i32) -> (i32, i32, i32) {
    %c0_i32 = arith.constant 0 : i32
    %c0_i32_0 = arith.constant 0 : i32
    %c0_i32_1 = arith.constant 0 : i32
    return %arg0, %c0_i32, %c0_i32_0 : i32, i32, i32
  }
}

</mosaic_0001>

<bundles_post_ra>
// kernel: tpu_custom_call.1
= control target key start
LH: loop header
LB: loop body
LE: loop exit
PB: predicated region body
PF: predicated region fallthrough
CT: control target
= control target key end

     0   :  { %8 = vsyncpa [#allocation3], 0  ;;  %s388_s0 = inlined_call_operand.vmem [shape: f32[1,8,256], index: 0, kind: input, shape index: {}]   ;;  %s389_s1 = inlined_call_operand.hbm [shape: f32[9,8,256], index: 1, kind: input, shape index: {}]   ;;  %s390_s2 = inlined_call_operand.vmem [shape: f32[16,8], index: 2, kind: input, shape index: {}]   ;;  %s391_s3 = inlined_call_operand.hbm [shape: f32[1,16,256], index: 3, kind: output, shape index: {}]  }
   0x1   :  { %9 = vsyncpa [#allocation4], 0  ;;  %s316_s12 = smov [#allocation2]  }
   0x2   :  { %s17_s13 = sshll.u32 %s316_s12, 4  ;;  %s18_s13 = int_to_ptr.vmem [resolvable:$true] %s17_s13 }
   0x3   :  { %s280_s14 = scalar_lea.vmem %s18_s13, 2304  ;;  %p285_p1 = scmp.lt.s32.totalorder %s18_s13, %s18_s13 }
   0x4   :  { %p281_p0 = scmp.ne.s32.totalorder %s18_s13, %s280_s14  ;;  %p286_p2 = scmp.lt.s32.totalorder %s280_s14, %s280_s14 }
   0x6   :  { %p287_p3 = por %p286_p2, %p285_p1 }
   0x8   :  { %p288_p4 = pnand %p287_p3, %p281_p0 }
   0xa   :  { %291 = shalt.err (!%p288_p4)
}
   0xb   :  { %s317_s15 = smov 256   ;;  %s318_s16 = smov 16  }
   0xc   :  { %23 = dma.hbm_to_vmem [thread:$0]  %s389_s1, 2304, %s18_s13, [#allocation3], %s317_s15, %s317_s15, %s318_s16  }
   0xd   :  { %312 = dma.done.wait [#allocation3], 2304  }
   0xe   :  { %313 = vsyncadd [#allocation3], 4294964992  ;;  %v29_v0 = vld [vmem:[%s388_s0] sm:$0xff]  ;;  %s319_s21 = smov 17   ;;  %v30_v1 = vld [vmem:[%s388_s0 + $0x8] sm:$0xff]  ;;  %s320_s24 = smov 15   ;;  %v40_v3 = vlaneseq }
   0xf   :  { %51 = vrot.lane.b32.xlu1 %v29_v0, %s318_s16  ;;  %36 = vrot.lane.b32.xlu0 %v29_v0, %s319_s21  ;;  %s321_s1 = smov 1   ;;  %s322_s25 = smov 127   ;;  %v324_v2 = vmov 0.0   ;;  %v32_v9 = vld [vmem:[#allocation2 + $0x40] sm:$0xff]  ;;  %v33_v10 = vld [vmem:[#allocation2 + $0x48] sm:$0xff]  ;;  %v59_v23 = vld [vmem:[#allocation2 + $0x10] sm:$0xff] }
  0x10   :  { %s323_s26 = smov 113   ;;  %222 = vmatprep.mubr.f32.mxu0 %v324_v2  ;;  %228 = vmatprep.mubr.f32.mxu1 %v324_v2  ;;  %s325_s27 = smov 112   ;;  %v362_v6 = vand.u32 127, %v40_v3  ;;  %v45_v11 = vld [vmem:[#allocation2] sm:$0xff]  ;;  %v46_v12 = vld [vmem:[#allocation2 + $0x8] sm:$0xff]  ;;  %v35_v17 = vmul.f32 %v33_v10, %v30_v1  ;;  %v34_v18 = vmul.f32 %v32_v9, %v29_v0  ;;  %v60_v24 = vld [vmem:[#allocation2 + $0x18] sm:$0xff] }
  0x11   :  { %s326_s0 = smov 111   ;;  %v73_v29 = vld [vmem:[#allocation2 + $0x20] sm:$0xff]  ;;  %v74_v30 = vld [vmem:[#allocation2 + $0x28] sm:$0xff]  ;;  %v87_v37 = vld [vmem:[#allocation2 + $0x30] sm:$0xff]  ;;  %vm151_vm8 = vcmask 64512   ;;  %s327_s5 = smov [#allocation5]  }
  0x12   :  { %vm42_vm0 = vcmp.lt.s32.totalorder %v362_v6, 17  ;;  %vm55_vm1 = vcmp.lt.s32.totalorder %v362_v6, 16  ;;  %vm69_vm2 = vcmp.lt.s32.totalorder %v362_v6, 15  ;;  %vm83_vm3 = vcmp.lt.s32.totalorder %v362_v6, 1  ;;  %v88_v38 = vld [vmem:[#allocation2 + $0x38] sm:$0xff]  ;;  %v101_v45 = vld [vmem:[#allocation2 + $0x50] sm:$0xff] }
  0x13   :  { %53 = vrot.lane.b32.xlu1 %v30_v1, %s318_s16  ;;  %38 = vrot.lane.b32.xlu0 %v30_v1, %s319_s21  ;;  %vm97_vm4 = vcmp.lt.s32.totalorder %v362_v6, 127  ;;  %vm111_vm5 = vcmp.lt.s32.totalorder %v362_v6, 113  ;;  %v102_v46 = vld [vmem:[#allocation2 + $0x58] sm:$0xff]  ;;  %v115_v53 = vld [vmem:[#allocation2 + $0x60] sm:$0xff]  ;;  %v116_v54 = vld [vmem:[#allocation2 + $0x68] sm:$0xff]  ;;  %vm125_vm6 = vcmp.lt.s32.totalorder %v362_v6, 112 }
  0x14   :  { %v129_v61 = vld [vmem:[#allocation2 + $0x70] sm:$0xff]  ;;  %v130_v62 = vld [vmem:[#allocation2 + $0x78] sm:$0xff]  ;;  %vm139_vm7 = vcmp.lt.s32.totalorder %v362_v6, 111  ;;  %v149_v6 = vld [vmem:[%s390_s2] sm:$0xff]  ;;  %s244_s6 = sshll.u32 %s327_s5, 4  ;;  %s245_s6 = int_to_ptr.vmem [resolvable:$true] %s244_s6 }
  0x15   :  { %s292_s7 = scalar_lea.vmem %s245_s6, 512  ;;  %p297_p6 = scmp.lt.s32.totalorder %s245_s6, %s245_s6 }
  0x16   :  { %p293_p5 = scmp.ne.s32.totalorder %s245_s6, %s292_s7  ;;  %p298_p7 = scmp.lt.s32.totalorder %s292_s7, %s292_s7 }
  0x17   :  { %67 = vrot.lane.b32.xlu1 %v30_v1, %s320_s24  ;;  %65 = vrot.lane.b32.xlu0 %v29_v0, %s320_s24 }
  0x18   :  { %p299_p8 = por %p298_p7, %p297_p6 }
  0x1a   :  { %p300_p9 = pnand %p299_p8, %p293_p5 }
  0x1b   :  { %81 = vrot.lane.b32.xlu1 %v30_v1, %s321_s1  ;;  %79 = vrot.lane.b32.xlu0 %v29_v0, %s321_s1 }
  0x1f   :  { %95 = vrot.lane.b32.xlu1 %v30_v1, %s322_s25  ;;  %93 = vrot.lane.b32.xlu0 %v29_v0, %s322_s25 }
  0x23   :  { %109 = vrot.lane.b32.xlu1 %v30_v1, %s323_s26  ;;  %107 = vrot.lane.b32.xlu0 %v29_v0, %s323_s26 }
  0x27   :  { %123 = vrot.lane.b32.xlu1 %v30_v1, %s325_s27  ;;  %121 = vrot.lane.b32.xlu0 %v29_v0, %s325_s27 }
  0x2b   :  { %137 = vrot.lane.b32.xlu1 %v30_v1, %s326_s0  ;;  %135 = vrot.lane.b32.xlu0 %v29_v0, %s326_s0 }
  0x81   :  { %v52_v4 = vpop.permute.xlu1 %51  ;;  %v37_v5 = vpop.permute.xlu0 %36 }
  0x85   :  { %v54_v7 = vpop.permute.xlu1 %53  ;;  %v39_v8 = vpop.permute.xlu0 %38 }
  0x86   :  { %v43_v13 = vsel %vm42_vm0, %v37_v5, %v39_v8  ;;  %v44_v14 = vsel %vm42_vm0, %v39_v8, %v37_v5  ;;  %v56_v25 = vsel %vm55_vm1, %v52_v4, %v54_v7  ;;  %v57_v26 = vsel %vm55_vm1, %v54_v7, %v52_v4 }
  0x87   :  { %v47_v19 = vmul.f32 %v45_v11, %v44_v14  ;;  %v48_v20 = vmul.f32 %v46_v12, %v43_v13  ;;  %v61_v33 = vmul.f32 %v59_v23, %v57_v26  ;;  %v62_v34 = vmul.f32 %v60_v24, %v56_v25  ;;  %v143_v12 = vld [vmem:[#allocation2 + $0x80] sm:$0xff]  ;;  %v144_v13 = vld [vmem:[#allocation2 + $0x88] sm:$0xff] }
  0x88   :  { %v150_v26 = vld [vmem:[%s390_s2 + $0x8] sm:$0xff] }
  0x89   :  { %v68_v15 = vpop.permute.xlu1 %67  ;;  %v66_v16 = vpop.permute.xlu0 %65  ;;  %v49_v27 = vadd.f32 %v47_v19, %v34_v18  ;;  %v50_v28 = vadd.f32 %v48_v20, %v35_v17 }
  0x8a   :  { %v70_v31 = vsel %vm69_vm2, %v66_v16, %v68_v15  ;;  %v71_v32 = vsel %vm69_vm2, %v68_v15, %v66_v16 }
  0x8b   :  { %v64_v41 = vadd.f32 %v62_v34, %v50_v28  ;;  %v63_v42 = vadd.f32 %v61_v33, %v49_v27  ;;  %v75_v43 = vmul.f32 %v73_v29, %v71_v32  ;;  %v76_v44 = vmul.f32 %v74_v30, %v70_v31 }
  0x8d   :  { %v82_v21 = vpop.permute.xlu1 %81  ;;  %v80_v22 = vpop.permute.xlu0 %79  ;;  %v77_v57 = vadd.f32 %v75_v43, %v63_v42  ;;  %v78_v58 = vadd.f32 %v76_v44, %v64_v41 }
  0x8e   :  { %v84_v39 = vsel %vm83_vm3, %v80_v22, %v82_v21  ;;  %v85_v40 = vsel %vm83_vm3, %v82_v21, %v80_v22 }
  0x8f   :  { %v89_v49 = vmul.f32 %v87_v37, %v85_v40  ;;  %v90_v50 = vmul.f32 %v88_v38, %v84_v39 }
  0x91   :  { %v96_v35 = vpop.permute.xlu1 %95  ;;  %v94_v36 = vpop.permute.xlu0 %93  ;;  %v91_v63 = vadd.f32 %v89_v49, %v77_v57  ;;  %v92_v0 = vadd.f32 %v90_v50, %v78_v58 }
  0x92   :  { %v98_v47 = vsel %vm97_vm4, %v94_v36, %v96_v35  ;;  %v99_v48 = vsel %vm97_vm4, %v96_v35, %v94_v36 }
  0x93   :  { %v103_v59 = vmul.f32 %v101_v45, %v98_v47  ;;  %v104_v60 = vmul.f32 %v102_v46, %v99_v48 }
  0x95   :  { %v110_v51 = vpop.permute.xlu1 %109  ;;  %v108_v52 = vpop.permute.xlu0 %107  ;;  %v105_v8 = vadd.f32 %v103_v59, %v91_v63  ;;  %v106_v9 = vadd.f32 %v104_v60, %v92_v0 }
  0x96   :  { %v112_v55 = vsel %vm111_vm5, %v108_v52, %v110_v51  ;;  %v113_v56 = vsel %vm111_vm5, %v110_v51, %v108_v52 }
  0x97   :  { %v117_v1 = vmul.f32 %v115_v53, %v112_v55  ;;  %v118_v2 = vmul.f32 %v116_v54, %v113_v56 }
  0x99   :  { %v124_v3 = vpop.permute.xlu1 %123  ;;  %v122_v4 = vpop.permute.xlu0 %121  ;;  %v119_v14 = vadd.f32 %v117_v1, %v105_v8  ;;  %v120_v15 = vadd.f32 %v118_v2, %v106_v9 }
  0x9a   :  { %v126_v5 = vsel %vm125_vm6, %v122_v4, %v124_v3  ;;  %v127_v7 = vsel %vm125_vm6, %v124_v3, %v122_v4 }
  0x9b   :  { %v131_v10 = vmul.f32 %v129_v61, %v126_v5  ;;  %v132_v11 = vmul.f32 %v130_v62, %v127_v7 }
  0x9d   :  { %v138_v16 = vpop.permute.xlu1 %137  ;;  %v136_v17 = vpop.permute.xlu0 %135  ;;  %v134_v22 = vadd.f32 %v132_v11, %v120_v15  ;;  %v133_v23 = vadd.f32 %v131_v10, %v119_v14 }
  0x9e   :  { %v140_v18 = vsel %vm139_vm7, %v136_v17, %v138_v16  ;;  %v141_v19 = vsel %vm139_vm7, %v138_v16, %v136_v17 }
  0x9f   :  { %v145_v20 = vmul.f32 %v143_v12, %v140_v18  ;;  %v146_v21 = vmul.f32 %v144_v13, %v141_v19 }
  0xa1   :  { %v148_v24 = vadd.f32 %v146_v21, %v134_v22  ;;  %v147_v25 = vadd.f32 %v145_v20, %v133_v23 }
  0xa3   :  { %188 = vmatprep.subr.mxu0 %v148_v24  ;;  %258 = vmatprep.subr.mxu1 %v148_v24 }
  0xa4   :  { %189 = vmatpush1.msra.mxu0 %v147_v25  ;;  %259 = vmatpush1.msra.mxu1 %v147_v25 }
  0xa5   :  { %256 = vmatmul.mubr.msk.f32.vlgmr.msra.gmra.mxu0 %vm151_vm8, %v149_v6  ;;  %257 = vmatmul.mubr.msk.f32.vlgmr.msra.gmra.mxu1 %vm151_vm8, %v150_v26 }
 0x165   :  { %v224_v27 = vpop.f32.mrf.mxu0  ;;  %v230_v28 = vpop.f32.mrf.mxu1 }
 0x166   :  { %235 = vst [vmem:[#allocation5] sm:$0xff] %v224_v27  ;;  %237 = vst [vmem:[#allocation5 + $0x10] sm:$0xff] %v230_v28 }
 0x167   :  { %v226_v29 = vpop.f32.mrf.mxu0  ;;  %v232_v30 = vpop.f32.mrf.mxu1 }
 0x168   :  { %236 = vst [vmem:[#allocation5 + $0x8] sm:$0xff] %v226_v29  ;;  %238 = vst [vmem:[#allocation5 + $0x18] sm:$0xff] %v232_v30 }
 0x169   :  { %303 = shalt.err (!%p300_p9)
}
 0x16a   :  { %250 = dma.vmem_to_hbm [thread:$0]  %s245_s6, 512, %s391_s3, [#allocation4], %s317_s15, %s317_s15, %s318_s16  }
 0x16b   :  { %314 = dma.done.wait [#allocation4], 512  }
 0x16c   :  { %315 = vsyncadd [#allocation4], 4294966784 }
 0x16d   :  { %254 = vsyncpa [#allocation3], 1 }
 0x16e   :  { %255 = vsyncpa [#allocation4], 1 }

</bundles_post_ra>
